<compile_context>
chip_gen: v7x
topology: tpu7x:2x2x1
jax: 0.10.0
libtpu: 0.0.40
codegen_flags: <defaults>
</compile_context>

<pallas_src>
import jax
import jax.numpy as jnp
from jax import lax
from jax.experimental import pallas as pl
from jax.experimental.pallas import tpu as pltpu

LANES = 128                            # lane width (last dim of every block)
CH_ROWS = 512                          # rows per in-kernel chunk (fori_loop granularity)
TARGET_BLOCK_BYTES = 2 * 1024 * 1024   # ~2 MiB per input block per grid step


def _num_tensorcores() -> int:
    """2 on chips with two TensorCores per chip (v7x); 1 otherwise (v5e/v6e)."""
    try:
        dev = jax.devices()[0]
        if dev.platform == "tpu":
            kind = str(getattr(dev, "device_kind", "")).lower()
            if "v7" in kind or "7x" in kind:
                return 2
    except Exception:
        pass
    return 1


def _choose_tiles(r_rows, itemsize, max_block_rows):
    """Pick (rows-per-block tm, rows-per-chunk ch) with tm % ch == 0 and tm <= r_rows."""
    tm_target = max(CH_ROWS,
                    (TARGET_BLOCK_BYTES // (LANES * itemsize)) // CH_ROWS * CH_ROWS)
    if max_block_rows is not None:
        tm_target = min(tm_target, max(8, (max_block_rows // 8) * 8))
    if r_rows >= CH_ROWS and tm_target >= CH_ROWS:
        tm = min(tm_target, (r_rows // CH_ROWS) * CH_ROWS)
        ch = CH_ROWS
    else:
        tm = min((r_rows // 8) * 8, max(8, (tm_target // 8) * 8))
        ch = tm
    return tm, ch


def _build_kernel(tm, ch, gs, g_total, partial_rows):
    """Kernel closure over static tile sizes / grid extents.

    tm: rows per block; ch: rows per chunk (tm % ch == 0); gs: blocks per shard;
    g_total: number of real blocks; partial_rows: valid rows in the last block
    (0 if the last block is full).
    """

    def block_moments(yhat_ref, y_ref, px, py, valid_rows):
        # Stream the (tm, 128) block in (ch, 128) chunks so intermediates stay
        # register-resident; accumulate six (8, 128) partial moments in the carry.
        def red(v):                      # (ch, 128) -> (8, 128) in-register pre-reduction
            return jnp.sum(v.reshape(ch // 8, 8, LANES), axis=0)

        def body(j, carry):
            cnt, sx, sy, sxx, syy, sxy = carry
            r0 = pl.multiple_of(j * ch, ch)
            yh = yhat_ref[pl.ds(r0, ch), :].astype(jnp.float32)
            yv = y_ref[pl.ds(r0, ch), :].astype(jnp.float32)
            valid = jnp.logical_not(jnp.isnan(yv))
            if valid_rows is not None:   # only the final (partial) block pays for this
                rows = lax.broadcasted_iota(jnp.int32, (ch, LANES), 0) + j * ch
                valid = jnp.logical_and(valid, rows < valid_rows)
            m = valid.astype(jnp.float32)
            x = jnp.where(valid, yh - px, 0.0)
            t = jnp.where(valid, yv - py, 0.0)
            return (cnt + red(m), sx + red(x), sy + red(t),
                    sxx + red(x * x), syy + red(t * t), sxy + red(x * t))

        z = jnp.zeros((8, LANES), jnp.float32)
        return lax.fori_loop(0, tm // ch, body, (z,) * 6, unroll=True)

    def kernel(piv_ref, yhat_ref, y_ref, out_ref):
        c = pl.program_id(0)             # shard (TensorCore) index
        i = pl.program_id(1)             # row-block index within the shard
        blk = c * gs + i                 # logical block index

        # Output block is VMEM-resident across the reduction axis; zero it once.
        @pl.when(i == 0)
        def _():
            out_ref[...] = jnp.zeros_like(out_ref)

        px = piv_ref[0]                  # pivots as SMEM scalars
        py = piv_ref[1]

        def accumulate(valid_rows):
            parts = block_moments(yhat_ref, y_ref, px, py, valid_rows)
            for k in range(6):
                out_ref[0, k] += parts[k]

        if partial_rows == 0:
            # Every real block is full.  Phantom blocks (clamped in the index_map
            # when the block range does not split evenly across shards) are skipped
            # so they cannot double-count.
            @pl.when(blk < g_total)
            def _():
                accumulate(None)
        else:
            @pl.when(blk < g_total - 1)
            def _():
                accumulate(None)

            @pl.when(blk == g_total - 1)  # only this block pays for the row mask
            def _():
                accumulate(partial_rows)

    return kernel


def corr_loss(yhat, y, max_block_rows=None):
    """Pallas implementation of CorrLoss.forward(yhat, y) -> scalar f32 (Pearson r)."""
    yhat_f = jnp.ravel(yhat)
    y_f = jnp.ravel(y)
    n = yhat_f.shape[0]

    # ---- pivots: approximate means from a small prefix.  Pearson r is shift
    # invariant, so subtracting any finite constant is algebraically exact while
    # killing raw-moment catastrophic cancellation when |mean| >> std.
    k = min(n, 1024)
    hx = yhat_f[:k].astype(jnp.float32)
    hy = y_f[:k].astype(jnp.float32)
    hm = jnp.logical_not(jnp.isnan(hy))
    hcnt = jnp.sum(hm.astype(jnp.float32))
    hsafe = jnp.maximum(hcnt, 1.0)
    px = jnp.where(hcnt > 0, jnp.sum(jnp.where(hm, hx, 0.0)) / hsafe, 0.0)
    py = jnp.where(hcnt > 0, jnp.sum(jnp.where(hm, hy, 0.0)) / hsafe, 0.0)
    piv = jnp.stack([px, py])            # (2,) f32 -> SMEM inside the kernel

    # ---- main region handled by the kernel: the 128-aligned prefix as an (R, 128)
    # lane-dense slab.  The (<128-element) ragged tail is folded in with plain JAX
    # below, so no whole-array pad is materialized when n % 128 == 0.
    r_rows = n // LANES
    if r_rows >= 8:
        n_main = r_rows * LANES
        itemsize = max(yhat_f.dtype.itemsize, y_f.dtype.itemsize)
        tm, ch = _choose_tiles(r_rows, itemsize, max_block_rows)
        g_total = (r_rows + tm - 1) // tm
        partial_rows = r_rows % tm
        num_shards = _num_tensorcores()
        gs = (g_total + num_shards - 1) // num_shards

        # TODO(synk): when n % 128 != 0 this prefix slice still materializes one copy
        # of each input; a memory_space=pl.ANY + manual-DMA path would avoid it.
        yhat2 = (yhat_f if n_main == n else yhat_f[:n_main]).reshape(r_rows, LANES)
        y2 = (y_f if n_main == n else y_f[:n_main]).reshape(r_rows, LANES)

        def data_map(c, i):
            # Phantom blocks of the last shard are clamped onto a real block; the
            # kernel skips their accumulation (blk >= g_total).
            return (jnp.minimum(c * gs + i, g_total - 1), 0)

        if num_shards > 1:
            dims = (getattr(pltpu, "CORE_PARALLEL", "parallel"),
                    getattr(pltpu, "ARBITRARY", "arbitrary"))
        else:
            dims = ("arbitrary", "arbitrary")

        out = pl.pallas_call(
            _build_kernel(tm, ch, gs, g_total, partial_rows),
            out_shape=jax.ShapeDtypeStruct((num_shards, 6, 8, LANES), jnp.float32),
            grid_spec=pltpu.PrefetchScalarGridSpec(
                num_scalar_prefetch=0,
                grid=(num_shards, gs),
                in_specs=[
                    pl.BlockSpec(memory_space=pltpu.MemorySpace.SMEM),  # pivots
                    pl.BlockSpec((tm, LANES), data_map),                # yhat rows
                    pl.BlockSpec((tm, LANES), data_map),                # y rows
                ],
                out_specs=pl.BlockSpec((1, 6, 8, LANES), lambda c, i: (c, 0, 0, 0)),
            ),
            compiler_params=pltpu.CompilerParams(
                dimension_semantics=dims,
                vmem_limit_bytes=32 * 1024 * 1024,
            ),
        )(piv, yhat2, y2)
        mom = jnp.sum(out, axis=(0, 2, 3))        # (6,) shard+lane+sublane reduce
    else:
        n_main = 0
        mom = jnp.zeros((6,), jnp.float32)

    # ---- ragged tail (and tiny-input fallback): plain JAX moments relative to the
    # same pivots, combined exactly with the kernel partials.
    if n_main < n:
        tx = yhat_f[n_main:].astype(jnp.float32)
        ty = y_f[n_main:].astype(jnp.float32)
        tmask = jnp.logical_not(jnp.isnan(ty))
        tmf = tmask.astype(jnp.float32)
        txs = jnp.where(tmask, tx - px, 0.0)
        tys = jnp.where(tmask, ty - py, 0.0)
        mom = mom + jnp.stack([jnp.sum(tmf), jnp.sum(txs), jnp.sum(tys),
                               jnp.sum(txs * txs), jnp.sum(tys * tys),
                               jnp.sum(txs * tys)])

    # ---- tiny finalize: Pearson r from pivot-shifted moments (algebraically exact).
    cnt, sx, sy, sxx, syy, sxy = mom[0], mom[1], mom[2], mom[3], mom[4], mom[5]
    mx = sx / cnt
    my = sy / cnt
    cov = sxy - cnt * mx * my
    varx = sxx - cnt * mx * mx
    vary = syy - cnt * my * my
    # Matches the torch reference's failure modes (all-NaN target or zero variance
    # -> non-finite result).
    return cov / jnp.sqrt(varx * vary)


def corr_loss_ref(yhat, y):
    """Pure-JAX reference matching the torch pearsonr semantics."""
    x = jnp.ravel(yhat).astype(jnp.float32)
    t = jnp.ravel(y).astype(jnp.float32)
    mask = ~jnp.isnan(t)
    n = jnp.sum(mask.astype(jnp.float32))
    x = jnp.where(mask, x, 0.0)
    t = jnp.where(mask, t, 0.0)
    mx = jnp.sum(x) / n
    my = jnp.sum(t) / n
    cx = jnp.where(mask, x - mx, 0.0)
    cy = jnp.where(mask, t - my, 0.0)
    return jnp.sum(cx * cy) / jnp.sqrt(jnp.sum(cx * cx) * jnp.sum(cy * cy))


if __name__ == "__main__":
    key = jax.random.PRNGKey(0)
    k1, k2, k3, k4 = jax.random.split(key, 4)

    # Case 1: regression-head style output (B, C, H, W) with NaNs in the target.
    shape = (2, 4, 16, 16)                       # 2048 elements -> (16, 128) slab
    yhat = jax.random.normal(k1, shape, dtype=jnp.float32)
    y = 0.7 * yhat + 0.3 * jax.random.normal(k2, shape, dtype=jnp.float32)
    y = jnp.ravel(y).at[jnp.array([0, 7, 100, 555, 2047])].set(jnp.nan).reshape(shape)

    r1 = jax.block_until_ready(corr_loss(yhat, y))
    r1_ref = jax.block_until_ready(corr_loss_ref(yhat, y))
    assert jnp.isfinite(r1), "case 1: non-finite result"
    assert abs(float(r1) - float(r1_ref)) < 1e-4, (float(r1), float(r1_ref))

    # Case 2: small block size forces multiple row blocks (multi-block reduction),
    # and a +100 offset exercises the pivot stabilization.
    r2 = jax.block_until_ready(corr_loss(yhat + 100.0, y + 100.0, max_block_rows=8))
    r2_ref = jax.block_until_ready(corr_loss_ref(yhat + 100.0, y + 100.0))
    assert abs(float(r2) - float(r2_ref)) < 1e-4, (float(r2), float(r2_ref))

    # Case 3: element count not a multiple of 128 -> kernel on the aligned prefix,
    # ragged tail folded in by the wrapper (no whole-array pad/copy in the kernel path).
    shape3 = (5, 7, 31)                          # 1085 elements = 8 rows + 61 tail
    yh3 = jax.random.normal(k3, shape3, dtype=jnp.float32)
    y3 = 0.5 * yh3 + 0.5 * jax.random.normal(k4, shape3, dtype=jnp.float32)
    y3 = jnp.ravel(y3).at[jnp.array([3, 50, 1024, 1084])].set(jnp.nan).reshape(shape3)
    r3 = jax.block_until_ready(corr_loss(yh3, y3))
    r3_ref = jax.block_until_ready(corr_loss_ref(yh3, y3))
    assert abs(float(r3) - float(r3_ref)) < 1e-4, (float(r3), float(r3_ref))

    # Case 4: row count not a multiple of the block size -> exercises the row-masked
    # final partial block (the only block that computes a mask iota).
    shape4 = (2, 4, 16, 25)                      # 3200 elements = 25 rows of 128
    yh4 = jax.random.normal(k1, shape4, dtype=jnp.float32)
    y4 = 0.6 * yh4 + 0.4 * jax.random.normal(k2, shape4, dtype=jnp.float32)
    y4 = jnp.ravel(y4).at[jnp.array([17, 2049, 3199])].set(jnp.nan).reshape(shape4)
    r4 = jax.block_until_ready(corr_loss(yh4, y4))
    r4_ref = jax.block_until_ready(corr_loss_ref(yh4, y4))
    assert abs(float(r4) - float(r4_ref)) < 1e-4, (float(r4), float(r4_ref))

    print("KERNEL_OK")
</pallas_src>

<mosaic_0001>
module attributes {stable_mosaic.version = 11 : i64} {
  func.func @kernel(%arg0: i32, %arg1: i32, %arg2: memref<2xf32, #tpu.memory_space<smem>>, %arg3: memref<16x128xf32, #tpu.memory_space<vmem>>, %arg4: memref<16x128xf32, #tpu.memory_space<vmem>>, %arg5: memref<1x6x8x128xf32, #tpu.memory_space<vmem>>) attributes {dimension_semantics = [#tpu.dimension_semantics<arbitrary>, #tpu.dimension_semantics<arbitrary>], iteration_bounds = array<i64: 1, 1>, scalar_prefetch = 0 : i64, scratch_operands = 0 : i64, tpu.core_type = #tpu.core_type<tc>, window_params = [{transform_indices = @transform_0, window_bounds = array<i64: 2>}, {transform_indices = @transform_1, window_bounds = array<i64: 16, 128>}, {transform_indices = @transform_2, window_bounds = array<i64: 16, 128>}, {transform_indices = @transform_3, window_bounds = array<i64: 1, 6, 8, 128>}]} {
    %c1_i32 = arith.constant 1 : i32
    %0 = arith.muli %arg0, %c1_i32 : i32
    %1 = arith.addi %0, %arg1 : i32
    %c0_i32 = arith.constant 0 : i32
    %2 = arith.cmpi eq, %arg1, %c0_i32 : i32
    %3 = arith.extui %2 : i1 to i32
    %c0_i32_0 = arith.constant 0 : i32
    %4 = arith.cmpi ne, %3, %c0_i32_0 : i32
    scf.if %4 {
      %cst = arith.constant 0.000000e+00 : f32
      %10 = vector.broadcast %cst : f32 to vector<1x6x8x128xf32>
      %c0_3 = arith.constant 0 : index
      %c0_4 = arith.constant 0 : index
      %c0_5 = arith.constant 0 : index
      %c0_6 = arith.constant 0 : index
      %11 = vector.load %arg5[%c0_3, %c0_4, %c0_5, %c0_6] : memref<1x6x8x128xf32, #tpu.memory_space<vmem>>, vector<1x6x8x128xf32>
      tpu.vector_store %arg5[%c0_3, %c0_4, %c0_5, %c0_6], %10 {strides = array<i32>} : memref<1x6x8x128xf32, #tpu.memory_space<vmem>>, vector<1x6x8x128xf32>,
    } else {
    }
    %c0 = arith.constant 0 : index
    %5 = memref.load %arg2[%c0] : memref<2xf32, #tpu.memory_space<smem>>
    %c1 = arith.constant 1 : index
    %6 = memref.load %arg2[%c1] : memref<2xf32, #tpu.memory_space<smem>>
    %c1_i32_1 = arith.constant 1 : i32
    %7 = arith.cmpi slt, %1, %c1_i32_1 : i32
    %8 = arith.extui %7 : i1 to i32
    %c0_i32_2 = arith.constant 0 : i32
    %9 = arith.cmpi ne, %8, %c0_i32_2 : i32
    scf.if %9 {
      %cst = arith.constant 0.000000e+00 : f32
      %10 = vector.broadcast %cst : f32 to vector<8x128xf32>
      %c0_i32_3 = arith.constant 0 : i32
      %c16_i32 = arith.constant 16 : i32
      %11 = arith.muli %c0_i32_3, %c16_i32 : i32
      %12 = tpu.assume_multiple %11, 16 : i32
      %13 = arith.index_cast %12 : i32 to index
      %c0_4 = arith.constant 0 : index
      %14 = vector.load %arg3[%13, %c0_4] : memref<16x128xf32, #tpu.memory_space<vmem>>, vector<16x128xf32>
      %15 = arith.index_cast %12 : i32 to index
      %c0_5 = arith.constant 0 : index
      %16 = vector.load %arg4[%15, %c0_5] : memref<16x128xf32, #tpu.memory_space<vmem>>, vector<16x128xf32>
      %17 = arith.cmpf one, %16, %16 : vector<16x128xf32>
      %cst_6 = arith.constant dense<true> : vector<16x128xi1>
      %18 = arith.xori %17, %cst_6 : vector<16x128xi1>
      %19 = arith.extui %18 : vector<16x128xi1> to vector<16x128xi32>
      %20 = arith.sitofp %19 : vector<16x128xi32> to vector<16x128xf32>
      %21 = vector.broadcast %5 : f32 to vector<16x128xf32>
      %22 = arith.subf %14, %21 : vector<16x128xf32>
      %cst_7 = arith.constant 0.000000e+00 : f32
      %23 = vector.broadcast %cst_7 : f32 to vector<16x128xf32>
      %24 = arith.select %18, %22, %23 : vector<16x128xi1>, vector<16x128xf32>
      %25 = vector.broadcast %6 : f32 to vector<16x128xf32>
      %26 = arith.subf %16, %25 : vector<16x128xf32>
      %cst_8 = arith.constant 0.000000e+00 : f32
      %27 = vector.broadcast %cst_8 : f32 to vector<16x128xf32>
      %28 = arith.select %18, %26, %27 : vector<16x128xi1>, vector<16x128xf32>
      %29 = vector.shape_cast %20 : vector<16x128xf32> to vector<2x8x128xf32>
      %cst_9 = arith.constant dense<0.000000e+00> : vector<8x128xf32>
      %30 = vector.multi_reduction <add>, %29, %cst_9 [0] : vector<2x8x128xf32> to vector<8x128xf32>
      %31 = arith.addf %10, %30 : vector<8x128xf32>
      %32 = vector.shape_cast %24 : vector<16x128xf32> to vector<2x8x128xf32>
      %cst_10 = arith.constant dense<0.000000e+00> : vector<8x128xf32>
      %33 = vector.multi_reduction <add>, %32, %cst_10 [0] : vector<2x8x128xf32> to vector<8x128xf32>
      %34 = arith.addf %10, %33 : vector<8x128xf32>
      %35 = vector.shape_cast %28 : vector<16x128xf32> to vector<2x8x128xf32>
      %cst_11 = arith.constant dense<0.000000e+00> : vector<8x128xf32>
      %36 = vector.multi_reduction <add>, %35, %cst_11 [0] : vector<2x8x128xf32> to vector<8x128xf32>
      %37 = arith.addf %10, %36 : vector<8x128xf32>
      %38 = arith.mulf %24, %24 : vector<16x128xf32>
      %39 = vector.shape_cast %38 : vector<16x128xf32> to vector<2x8x128xf32>
      %cst_12 = arith.constant dense<0.000000e+00> : vector<8x128xf32>
      %40 = vector.multi_reduction <add>, %39, %cst_12 [0] : vector<2x8x128xf32> to vector<8x128xf32>
      %41 = arith.addf %10, %40 : vector<8x128xf32>
      %42 = arith.mulf %28, %28 : vector<16x128xf32>
      %43 = vector.shape_cast %42 : vector<16x128xf32> to vector<2x8x128xf32>
      %cst_13 = arith.constant dense<0.000000e+00> : vector<8x128xf32>
      %44 = vector.multi_reduction <add>, %43, %cst_13 [0] : vector<2x8x128xf32> to vector<8x128xf32>
      %45 = arith.addf %10, %44 : vector<8x128xf32>
      %46 = arith.mulf %24, %28 : vector<16x128xf32>
      %47 = vector.shape_cast %46 : vector<16x128xf32> to vector<2x8x128xf32>
      %cst_14 = arith.constant dense<0.000000e+00> : vector<8x128xf32>
      %48 = vector.multi_reduction <add>, %47, %cst_14 [0] : vector<2x8x128xf32> to vector<8x128xf32>
      %49 = arith.addf %10, %48 : vector<8x128xf32>
      %c1_i32_15 = arith.constant 1 : i32
      %c0_16 = arith.constant 0 : index
      %c0_17 = arith.constant 0 : index
      %c0_18 = arith.constant 0 : index
      %c0_19 = arith.constant 0 : index
      %50 = vector.load %arg5[%c0_16, %c0_17, %c0_18, %c0_19] : memref<1x6x8x128xf32, #tpu.memory_space<vmem>>, vector<1x1x8x128xf32>
      %51 = vector.shape_cast %50 : vector<1x1x8x128xf32> to vector<8x128xf32>
      %52 = arith.addf %51, %31 : vector<8x128xf32>
      %c0_20 = arith.constant 0 : index
      %c0_21 = arith.constant 0 : index
      %c0_22 = arith.constant 0 : index
      %c0_23 = arith.constant 0 : index
      %53 = vector.load %arg5[%c0_20, %c0_21, %c0_22, %c0_23] : memref<1x6x8x128xf32, #tpu.memory_space<vmem>>, vector<1x1x8x128xf32>
      %54 = vector.shape_cast %53 : vector<1x1x8x128xf32> to vector<8x128xf32>
      %55 = vector.shape_cast %52 : vector<8x128xf32> to vector<1x1x8x128xf32>
      tpu.vector_store %arg5[%c0_20, %c0_21, %c0_22, %c0_23], %55 {strides = array<i32>} : memref<1x6x8x128xf32, #tpu.memory_space<vmem>>, vector<1x1x8x128xf32>,
      %c0_24 = arith.constant 0 : index
      %c1_25 = arith.constant 1 : index
      %c0_26 = arith.constant 0 : index
      %c0_27 = arith.constant 0 : index
      %56 = vector.load %arg5[%c0_24, %c1_25, %c0_26, %c0_27] : memref<1x6x8x128xf32, #tpu.memory_space<vmem>>, vector<1x1x8x128xf32>
      %57 = vector.shape_cast %56 : vector<1x1x8x128xf32> to vector<8x128xf32>
      %58 = arith.addf %57, %34 : vector<8x128xf32>
      %c0_28 = arith.constant 0 : index
      %c1_29 = arith.constant 1 : index
      %c0_30 = arith.constant 0 : index
      %c0_31 = arith.constant 0 : index
      %59 = vector.load %arg5[%c0_28, %c1_29, %c0_30, %c0_31] : memref<1x6x8x128xf32, #tpu.memory_space<vmem>>, vector<1x1x8x128xf32>
      %60 = vector.shape_cast %59 : vector<1x1x8x128xf32> to vector<8x128xf32>
      %61 = vector.shape_cast %58 : vector<8x128xf32> to vector<1x1x8x128xf32>
      tpu.vector_store %arg5[%c0_28, %c1_29, %c0_30, %c0_31], %61 {strides = array<i32>} : memref<1x6x8x128xf32, #tpu.memory_space<vmem>>, vector<1x1x8x128xf32>,
      %c0_32 = arith.constant 0 : index
      %c2 = arith.constant 2 : index
      %c0_33 = arith.constant 0 : index
      %c0_34 = arith.constant 0 : index
      %62 = vector.load %arg5[%c0_32, %c2, %c0_33, %c0_34] : memref<1x6x8x128xf32, #tpu.memory_space<vmem>>, vector<1x1x8x128xf32>
      %63 = vector.shape_cast %62 : vector<1x1x8x128xf32> to vector<8x128xf32>
      %64 = arith.addf %63, %37 : vector<8x128xf32>
      %c0_35 = arith.constant 0 : index
      %c2_36 = arith.constant 2 : index
      %c0_37 = arith.constant 0 : index
      %c0_38 = arith.constant 0 : index
      %65 = vector.load %arg5[%c0_35, %c2_36, %c0_37, %c0_38] : memref<1x6x8x128xf32, #tpu.memory_space<vmem>>, vector<1x1x8x128xf32>
      %66 = vector.shape_cast %65 : vector<1x1x8x128xf32> to vector<8x128xf32>
      %67 = vector.shape_cast %64 : vector<8x128xf32> to vector<1x1x8x128xf32>
      tpu.vector_store %arg5[%c0_35, %c2_36, %c0_37, %c0_38], %67 {strides = array<i32>} : memref<1x6x8x128xf32, #tpu.memory_space<vmem>>, vector<1x1x8x128xf32>,
      %c0_39 = arith.constant 0 : index
      %c3 = arith.constant 3 : index
      %c0_40 = arith.constant 0 : index
      %c0_41 = arith.constant 0 : index
      %68 = vector.load %arg5[%c0_39, %c3, %c0_40, %c0_41] : memref<1x6x8x128xf32, #tpu.memory_space<vmem>>, vector<1x1x8x128xf32>
      %69 = vector.shape_cast %68 : vector<1x1x8x128xf32> to vector<8x128xf32>
      %70 = arith.addf %69, %41 : vector<8x128xf32>
      %c0_42 = arith.constant 0 : index
      %c3_43 = arith.constant 3 : index
      %c0_44 = arith.constant 0 : index
      %c0_45 = arith.constant 0 : index
      %71 = vector.load %arg5[%c0_42, %c3_43, %c0_44, %c0_45] : memref<1x6x8x128xf32, #tpu.memory_space<vmem>>, vector<1x1x8x128xf32>
      %72 = vector.shape_cast %71 : vector<1x1x8x128xf32> to vector<8x128xf32>
      %73 = vector.shape_cast %70 : vector<8x128xf32> to vector<1x1x8x128xf32>
      tpu.vector_store %arg5[%c0_42, %c3_43, %c0_44, %c0_45], %73 {strides = array<i32>} : memref<1x6x8x128xf32, #tpu.memory_space<vmem>>, vector<1x1x8x128xf32>,
      %c0_46 = arith.constant 0 : index
      %c4 = arith.constant 4 : index
      %c0_47 = arith.constant 0 : index
      %c0_48 = arith.constant 0 : index
      %74 = vector.load %arg5[%c0_46, %c4, %c0_47, %c0_48] : memref<1x6x8x128xf32, #tpu.memory_space<vmem>>, vector<1x1x8x128xf32>
      %75 = vector.shape_cast %74 : vector<1x1x8x128xf32> to vector<8x128xf32>
      %76 = arith.addf %75, %45 : vector<8x128xf32>
      %c0_49 = arith.constant 0 : index
      %c4_50 = arith.constant 4 : index
      %c0_51 = arith.constant 0 : index
      %c0_52 = arith.constant 0 : index
      %77 = vector.load %arg5[%c0_49, %c4_50, %c0_51, %c0_52] : memref<1x6x8x128xf32, #tpu.memory_space<vmem>>, vector<1x1x8x128xf32>
      %78 = vector.shape_cast %77 : vector<1x1x8x128xf32> to vector<8x128xf32>
      %79 = vector.shape_cast %76 : vector<8x128xf32> to vector<1x1x8x128xf32>
      tpu.vector_store %arg5[%c0_49, %c4_50, %c0_51, %c0_52], %79 {strides = array<i32>} : memref<1x6x8x128xf32, #tpu.memory_space<vmem>>, vector<1x1x8x128xf32>,
      %c0_53 = arith.constant 0 : index
      %c5 = arith.constant 5 : index
      %c0_54 = arith.constant 0 : index
      %c0_55 = arith.constant 0 : index
      %80 = vector.load %arg5[%c0_53, %c5, %c0_54, %c0_55] : memref<1x6x8x128xf32, #tpu.memory_space<vmem>>, vector<1x1x8x128xf32>
      %81 = vector.shape_cast %80 : vector<1x1x8x128xf32> to vector<8x128xf32>
      %82 = arith.addf %81, %49 : vector<8x128xf32>
      %c0_56 = arith.constant 0 : index
      %c5_57 = arith.constant 5 : index
      %c0_58 = arith.constant 0 : index
      %c0_59 = arith.constant 0 : index
      %83 = vector.load %arg5[%c0_56, %c5_57, %c0_58, %c0_59] : memref<1x6x8x128xf32, #tpu.memory_space<vmem>>, vector<1x1x8x128xf32>
      %84 = vector.shape_cast %83 : vector<1x1x8x128xf32> to vector<8x128xf32>
      %85 = vector.shape_cast %82 : vector<8x128xf32> to vector<1x1x8x128xf32>
      tpu.vector_store %arg5[%c0_56, %c5_57, %c0_58, %c0_59], %85 {strides = array<i32>} : memref<1x6x8x128xf32, #tpu.memory_space<vmem>>, vector<1x1x8x128xf32>,
    } else {
    }
    return
  }
  func.func @transform_0(%arg0: i32, %arg1: i32) -> i32 {
    %c0_i32 = arith.constant 0 : i32
    %c0_i32_0 = arith.constant 0 : i32
    return %c0_i32 : i32
  }
  func.func @transform_1(%arg0: i32, %arg1: i32) -> (i32, i32) {
    %c1_i32 = arith.constant 1 : i32
    %0 = arith.muli %arg0, %c1_i32 : i32
    %1 = arith.addi %0, %arg1 : i32
    %c0_i32 = arith.constant 0 : i32
    %2 = arith.minsi %1, %c0_i32 : i32
    %c0_i32_0 = arith.constant 0 : i32
    %c0_i32_1 = arith.constant 0 : i32
    return %2, %c0_i32_0 : i32, i32
  }
  func.func @transform_2(%arg0: i32, %arg1: i32) -> (i32, i32) {
    %c1_i32 = arith.constant 1 : i32
    %0 = arith.muli %arg0, %c1_i32 : i32
    %1 = arith.addi %0, %arg1 : i32
    %c0_i32 = arith.constant 0 : i32
    %2 = arith.minsi %1, %c0_i32 : i32
    %c0_i32_0 = arith.constant 0 : i32
    %c0_i32_1 = arith.constant 0 : i32
    return %2, %c0_i32_0 : i32, i32
  }
  func.func @transform_3(%arg0: i32, %arg1: i32) -> (i32, i32, i32, i32) {
    %c0_i32 = arith.constant 0 : i32
    %c0_i32_0 = arith.constant 0 : i32
    %c0_i32_1 = arith.constant 0 : i32
    %c0_i32_2 = arith.constant 0 : i32
    return %arg0, %c0_i32, %c0_i32_0, %c0_i32_1 : i32, i32, i32, i32
  }
}

</mosaic_0001>

<bundles_post_ra>
// kernel: tpu_custom_call.1
= control target key start
LH: loop header
LB: loop body
LE: loop exit
PB: predicated region body
PF: predicated region fallthrough
CT: control target
= control target key end

     0   :  { %8 = vsyncpa [#allocation5], 0  ;;  %s377_s0 = inlined_call_operand.hbm [shape: f32[2], index: 0, kind: input, shape index: {}]   ;;  %s378_s1 = inlined_call_operand.hbm [shape: f32[16,128], index: 1, kind: input, shape index: {}]   ;;  %s379_s2 = inlined_call_operand.hbm [shape: f32[16,128], index: 2, kind: input, shape index: {}]   ;;  %s380_s3 = inlined_call_operand.hbm [shape: f32[1,6,8,128], index: 3, kind: output, shape index: {}]  }
   0x1   :  { %9 = vsyncpa [#allocation3], 0 }
   0x2   :  { %10 = vsyncpa [#allocation8], 0 }
   0x3   :  { %11 = vsyncpa [#allocation4], 0  ;;  %s188_s14 = scalar_lea.hbm %s377_s0, 16 }
   0x4   :  { %p189_p0 = scmp.ne.s32.totalorder %s377_s0, %s188_s14  ;;  %p192_p1 = scmp.lt.u32.totalorder %s188_s14, %s377_s0 }
   0x6   :  { %p194_p2 = pnand %p192_p1, %p189_p0 }
   0x8   :  { %197 = shalt.err (!%p194_p2)
}
   0x9   :  { %s272_s19 = smov [#allocation2]   ;;  %s273_s22 = smov [#allocation6]  }
   0xa   :  { %19 = dma.hbm_to_smem %s377_s0, 16, %s272_s19, [#allocation5]  }
   0xb   :  { %s31_s23 = sshll.u32 %s273_s22, 4  ;;  %s198_s26 = scalar_lea.hbm %s378_s1, 256  ;;  %s32_s23 = int_to_ptr.vmem [resolvable:$true] %s31_s23 }
   0xc   :  { %p199_p3 = scmp.ne.s32.totalorder %s378_s1, %s198_s26  ;;  %p202_p4 = scmp.lt.u32.totalorder %s198_s26, %s378_s1 }
   0xe   :  { %p204_p5 = pnand %p202_p4, %p199_p3 }
  0x10   :  { %207 = shalt.err (!%p204_p5)
}
  0x11   :  { %s208_s4 = scalar_lea.vmem %s32_s23, 256  ;;  %p213_p7 = scmp.lt.s32.totalorder %s32_s23, %s32_s23 }
  0x12   :  { %p209_p6 = scmp.ne.s32.totalorder %s32_s23, %s208_s4  ;;  %p214_p8 = scmp.lt.s32.totalorder %s208_s4, %s208_s4 }
  0x14   :  { %p215_p9 = por %p214_p8, %p213_p7 }
  0x16   :  { %p216_p10 = pnand %p215_p9, %p209_p6 }
  0x18   :  { %219 = shalt.err (!%p216_p10)
}
  0x19   :  { %s274_s0 = smov 128   ;;  %s275_s5 = smov 8  }
  0x1a   :  { %37 = dma.hbm_to_vmem [thread:$0]  %s378_s1, 256, %s32_s23, [#allocation3], %s274_s0, %s274_s0, %s275_s5  }
  0x1b   :  { %s276_s8 = smov [#allocation7]   ;;  %s220_s12 = scalar_lea.hbm %s379_s2, 256 }
  0x1c   :  { %s49_s9 = sshll.u32 %s276_s8, 4  ;;  %p221_p11 = scmp.ne.s32.totalorder %s379_s2, %s220_s12  ;;  %s50_s9 = int_to_ptr.vmem [resolvable:$true] %s49_s9 }
  0x1d   :  { %p224_p12 = scmp.lt.u32.totalorder %s220_s12, %s379_s2 }
  0x1f   :  { %p226_p13 = pnand %p224_p12, %p221_p11 }
  0x21   :  { %229 = shalt.err (!%p226_p13)
}
  0x22   :  { %s230_s17 = scalar_lea.vmem %s50_s9, 256  ;;  %p235_p1 = scmp.lt.s32.totalorder %s50_s9, %s50_s9 }
  0x23   :  { %p231_p0 = scmp.ne.s32.totalorder %s50_s9, %s230_s17  ;;  %p236_p2 = scmp.lt.s32.totalorder %s230_s17, %s230_s17 }
  0x25   :  { %p237_p3 = por %p236_p2, %p235_p1 }
  0x27   :  { %p238_p4 = pnand %p237_p3, %p231_p0 }
  0x29   :  { %241 = shalt.err (!%p238_p4)
}
  0x2a   :  { %55 = dma.hbm_to_vmem [thread:$0]  %s379_s2, 256, %s50_s9, [#allocation8], %s274_s0, %s274_s0, %s275_s5  }
  0x2b   :  { %264 = dma.done.wait [#allocation5], 16  }
  0x2c   :  { %265 = vsyncadd [#allocation5], 4294967280 }
  0x2d   :  { %266 = dma.done.wait [#allocation3], 256  }
  0x2e   :  { %267 = vsyncadd [#allocation3], 4294967040 }
  0x2f   :  { %268 = dma.done.wait [#allocation8], 256  }
  0x30   :  { %269 = vsyncadd [#allocation8], 4294967040 }
  0x31   :  { %65 = sfence }
  0x32   :  { %v93_v0 = vld [vmem:[#allocation7] sm:$0xff]  ;;  %v94_v1 = vld [vmem:[#allocation7 + $0x8] sm:$0xff]  ;;  %s85_s19 = sld [smem:[#allocation2]]  ;;  %s177_s20 = sld [smem:[#allocation2 + $0x1]]  ;;  %vm277_vm2 = vmmov 1   ;;  %v278_v4 = vmov 0.0  }
  0x33   :  { %vm95_vm0 = vcmp.ne.f32.partialorder %v93_v0, %v93_v0  ;;  %vm96_vm1 = vcmp.ne.f32.partialorder %v94_v1, %v94_v1  ;;  %v91_v7 = vld [vmem:[#allocation6] sm:$0xff]  ;;  %v92_v8 = vld [vmem:[#allocation6 + $0x8] sm:$0xff]  ;;  %s279_s2 = smov [#allocation9]  }
  0x34   :  { %vm342_vm3 = vmxor %vm95_vm0, %vm277_vm2  ;;  %s159_s21 = sshll.u32 %s279_s2, 4  ;;  %s160_s21 = int_to_ptr.vmem [resolvable:$true] %s159_s21 }
  0x35   :  { %vm346_vm4 = vmxor %vm96_vm1, %vm277_vm2  ;;  %v178_v5 = vsel %vm342_vm3, 1.0, %v278_v4  ;;  %s242_s22 = scalar_lea.vmem %s160_s21, 768  ;;  %p247_p6 = scmp.lt.s32.totalorder %s160_s21, %s160_s21 }
  0x36   :  { %v179_v6 = vsel %vm346_vm4, 1.0, %v278_v4  ;;  %p243_p5 = scmp.ne.s32.totalorder %s160_s21, %s242_s22  ;;  %p248_p7 = scmp.lt.s32.totalorder %s242_s22, %s242_s22 }
  0x37   :  { %v113_v9 = vadd.f32 %v179_v6, %v178_v5 }
  0x38   :  { %v103_v10 = vstv %s85_s19  ;;  %v108_v13 = vstv %s177_s20  ;;  %p249_p8 = por %p248_p7, %p247_p6 }
  0x39   :  { %v104_v11 = vsub.f32 %v91_v7, %v103_v10  ;;  %v105_v12 = vsub.f32 %v92_v8, %v103_v10  ;;  %v109_v14 = vsub.f32 %v93_v0, %v108_v13  ;;  %v110_v15 = vsub.f32 %v94_v1, %v108_v13  ;;  %133 = vst [vmem:[#allocation9] sm:$0xff] %v113_v9 }
  0x3a   :  { %p250_p9 = pnand %p249_p8, %p243_p5 }
  0x3b   :  { %v106_v16 = vsel %vm342_vm3, %v104_v11, 0.0  ;;  %v107_v17 = vsel %vm346_vm4, %v105_v12, 0.0  ;;  %v111_v19 = vsel %vm342_vm3, %v109_v14, 0.0  ;;  %v112_v20 = vsel %vm346_vm4, %v110_v15, 0.0 }
  0x3c   :  { %v115_v18 = vadd.f32 %v107_v17, %v106_v16  ;;  %v119_v21 = vmul.f32 %v106_v16, %v106_v16  ;;  %v117_v22 = vadd.f32 %v112_v20, %v111_v19  ;;  %v120_v23 = vmul.f32 %v107_v17, %v107_v17 }
  0x3d   :  { %v123_v24 = vmul.f32 %v111_v19, %v111_v19  ;;  %v124_v25 = vmul.f32 %v112_v20, %v112_v20  ;;  %v127_v26 = vmul.f32 %v111_v19, %v106_v16  ;;  %v128_v27 = vmul.f32 %v112_v20, %v107_v17 }
  0x3e   :  { %v121_v28 = vadd.f32 %v120_v23, %v119_v21  ;;  %137 = vst [vmem:[#allocation9 + $0x8] sm:$0xff] %v115_v18  ;;  %141 = vst [vmem:[#allocation9 + $0x10] sm:$0xff] %v117_v22 }
  0x3f   :  { %v125_v29 = vadd.f32 %v124_v25, %v123_v24  ;;  %v129_v30 = vadd.f32 %v128_v27, %v127_v26 }
  0x40   :  { %145 = vst [vmem:[#allocation9 + $0x18] sm:$0xff] %v121_v28 }
  0x41   :  { %149 = vst [vmem:[#allocation9 + $0x20] sm:$0xff] %v125_v29  ;;  %153 = vst [vmem:[#allocation9 + $0x28] sm:$0xff] %v129_v30 }
  0x42   :  { %253 = shalt.err (!%p250_p9)
}
  0x43   :  { %s254_s25 = scalar_lea.hbm %s380_s3, 768 }
  0x44   :  { %p255_p10 = scmp.ne.s32.totalorder %s380_s3, %s254_s25  ;;  %p258_p11 = scmp.lt.u32.totalorder %s254_s25, %s380_s3 }
  0x46   :  { %p260_p12 = pnand %p258_p11, %p255_p10 }
  0x48   :  { %263 = shalt.err (!%p260_p12)
}
  0x49   :  { %165 = dma.vmem_to_hbm [thread:$0]  %s160_s21, 768, %s380_s3, [#allocation4], %s274_s0, %s274_s0, %s275_s5  }
  0x4a   :  { %270 = dma.done.wait [#allocation4], 768  }
  0x4b   :  { %271 = vsyncadd [#allocation4], 4294966528 }
  0x4c   :  { %169 = vsyncpa [#allocation3], 1 }
  0x4d   :  { %170 = vsyncpa [#allocation8], 1 }
  0x4e   :  { %171 = vsyncpa [#allocation4], 1 }
  0x4f   :  { %172 = vsyncpa [#allocation5], 1 }

</bundles_post_ra>
